<compile_context>
chip_gen: v6e
topology: v6e:2x2x1
jax: 0.10.0
libtpu: 0.0.40
codegen_flags: <defaults>
</compile_context>

<pallas_src>
import functools

import jax
import jax.numpy as jnp
from jax.experimental import pallas as pl
from jax.experimental.pallas import tpu as pltpu


# ---------------------------------------------------------------------------
# Pallas kernel: one LightGCN layer, tiled over (row tiles, contraction tiles)
#   e_next   = A @ e                (bf16 inputs, f32 MXU accumulation)
#   acc_next = acc + e_next         (running layer-sum, f32)
#   final layer folds the 1/(L+1) mean scale into the writeback.
# ---------------------------------------------------------------------------
def _lightgcn_layer_kernel(a_ref, e_ref, acc_in_ref, e_out_ref, acc_out_ref,
                           e_scratch, *, inv_scale: float, is_last: bool):
    k = pl.program_id(1)

    @pl.when(k == 0)
    def _():
        e_scratch[...] = jnp.zeros_like(e_scratch)

    # bf16 x bf16 -> f32 accumulate on the MXU
    e_scratch[...] += jnp.dot(a_ref[...], e_ref[...],
                              preferred_element_type=jnp.float32)

    @pl.when(k == pl.num_programs(1) - 1)
    def _():
        e_new = e_scratch[...]
        e_out_ref[...] = e_new.astype(e_out_ref.dtype)      # bf16 input for next layer
        acc_new = acc_in_ref[...] + e_new
        if is_last:
            acc_new = acc_new * inv_scale                   # fused mean readout
        acc_out_ref[...] = acc_new


def _layer_call(a_bf16, e_bf16, acc_f32, *, tm, tk, inv_scale, is_last):
    n_pad, d = acc_f32.shape
    grid = (n_pad // tm, n_pad // tk)
    kernel = functools.partial(_lightgcn_layer_kernel,
                               inv_scale=inv_scale, is_last=is_last)
    flops = 2 * n_pad * n_pad * d
    bytes_accessed = (n_pad * n_pad * 2            # A (bf16)
                      + n_pad * d * (2 + 4)        # E in (bf16) + acc in (f32)
                      + n_pad * d * (2 + 4))       # E out (bf16) + acc out (f32)
    return pl.pallas_call(
        kernel,
        out_shape=(
            jax.ShapeDtypeStruct((n_pad, d), jnp.bfloat16),   # e_next
            jax.ShapeDtypeStruct((n_pad, d), jnp.float32),    # running accumulator
        ),
        grid_spec=pltpu.PrefetchScalarGridSpec(
            num_scalar_prefetch=0,
            grid=grid,
            in_specs=[
                pl.BlockSpec((tm, tk), lambda i, k: (i, k)),   # A tile
                pl.BlockSpec((tk, d), lambda i, k: (k, 0)),    # E tile
                pl.BlockSpec((tm, d), lambda i, k: (i, 0)),    # acc tile (read)
            ],
            out_specs=(
                pl.BlockSpec((tm, d), lambda i, k: (i, 0)),    # e_next tile
                pl.BlockSpec((tm, d), lambda i, k: (i, 0)),    # acc tile (write)
            ),
            scratch_shapes=[pltpu.VMEM((tm, d), jnp.float32)],
        ),
        compiler_params=pltpu.CompilerParams(
            dimension_semantics=("parallel", "arbitrary"),
            vmem_limit_bytes=48 << 20,     # leaves headroom on v7x's 64 MiB VMEM
        ),
        input_output_aliases={2: 1},       # accumulate into the running-mean buffer in place
        cost_estimate=pl.CostEstimate(
            flops=flops, transcendentals=0, bytes_accessed=bytes_accessed),
    )(a_bf16, e_bf16, acc_f32)


@functools.partial(jax.jit, static_argnames=("num_layers", "tm", "tk"))
def lightgcn_propagate(a_bf16, e0_f32, num_layers, tm, tk):
    """num_layers of propagation + fused layer-mean, on padded TPU-aligned arrays."""
    inv_scale = 1.0 / float(num_layers + 1)
    e = e0_f32.astype(jnp.bfloat16)        # cast once, not per layer
    acc = e0_f32                           # layer-0 term of the mean, f32
    for layer in range(num_layers):
        e, acc = _layer_call(a_bf16, e, acc, tm=tm, tk=tk,
                             inv_scale=inv_scale,
                             is_last=(layer == num_layers - 1))
    return acc


# ---------------------------------------------------------------------------
# Plain-JAX glue: embeddings, bipartite graph, normalized dense adjacency
# ---------------------------------------------------------------------------
def xavier_normal(key, shape):
    fan_in, fan_out = shape[0], shape[1]
    std = (2.0 / (fan_in + fan_out)) ** 0.5
    return jax.random.normal(key, shape, dtype=jnp.float32) * std


def create_bipartite_graph(user_indices, item_indices, num_users):
    u2i = jnp.stack([user_indices, item_indices + num_users])
    i2u = jnp.stack([item_indices + num_users, user_indices])
    return jnp.concatenate([u2i, i2u], axis=1)          # [2, num_edges]


def build_normalized_adjacency(edge_index, num_nodes):
    row, col = edge_index[0], edge_index[1]             # row = src, col = dst
    deg = jnp.zeros((num_nodes,), jnp.float32).at[col].add(1.0)
    deg_inv_sqrt = jnp.where(deg > 0, deg ** -0.5, 0.0)
    norm = deg_inv_sqrt[row] * deg_inv_sqrt[col]         # per-edge weight
    # dense A with A[dst, src] accumulating norm (aggr='add' at target node)
    a = jnp.zeros((num_nodes, num_nodes), jnp.float32).at[col, row].add(norm)
    return a


def _round_up(x, m):
    return (x + m - 1) // m * m


def lightgcn_forward(user_emb, item_emb, edge_index, num_layers, tm=256, tk=256):
    """Returns (user_final, item_final) exactly as LightGCN.forward (eval mode)."""
    num_users, d = user_emb.shape
    num_items = item_emb.shape[0]
    num_nodes = num_users + num_items

    all_emb = jnp.concatenate([user_emb, item_emb], axis=0)        # [N, D]
    a_norm = build_normalized_adjacency(edge_index, num_nodes)      # [N, N]

    # Pad node dimension to the tile size (multiple of 256 => full-lane vregs,
    # full MXU tiles, exact grid).  Embedding dim (128) is already lane aligned.
    n_pad = _round_up(num_nodes, max(tm, tk))
    a_pad = jnp.zeros((n_pad, n_pad), jnp.float32).at[:num_nodes, :num_nodes].set(a_norm)
    e_pad = jnp.zeros((n_pad, d), jnp.float32).at[:num_nodes, :].set(all_emb)

    a_bf16 = a_pad.astype(jnp.bfloat16)                  # cast once for all layers
    final = lightgcn_propagate(a_bf16, e_pad, num_layers, tm, tk)[:num_nodes]
    return final[:num_users], final[num_users:]


# ---------------------------------------------------------------------------
# Reference (pure JAX, f32) for verification
# ---------------------------------------------------------------------------
def lightgcn_forward_ref(user_emb, item_emb, edge_index, num_layers):
    num_users = user_emb.shape[0]
    num_nodes = num_users + item_emb.shape[0]
    all_emb = jnp.concatenate([user_emb, item_emb], axis=0)
    a_norm = build_normalized_adjacency(edge_index, num_nodes)
    layers = [all_emb]
    e = all_emb
    for _ in range(num_layers):
        e = a_norm @ e
        layers.append(e)
    final = jnp.mean(jnp.stack(layers), axis=0)
    return final[:num_users], final[num_users:]


if __name__ == "__main__":
    num_users = 8
    num_items = 16
    embedding_dim = 128
    num_layers = 3
    num_interactions = 40

    key = jax.random.PRNGKey(0)
    k_user, k_item, k_u, k_i = jax.random.split(key, 4)

    user_emb = xavier_normal(k_user, (num_users, embedding_dim))
    item_emb = xavier_normal(k_item, (num_items, embedding_dim))

    user_idx = jax.random.randint(k_u, (num_interactions,), 0, num_users)
    item_idx = jax.random.randint(k_i, (num_interactions,), 0, num_items)
    edge_index = create_bipartite_graph(user_idx, item_idx, num_users)   # [2, 2*num_interactions]

    user_final, item_final = lightgcn_forward(user_emb, item_emb, edge_index, num_layers)
    jax.block_until_ready((user_final, item_final))

    # correctness check against pure-JAX f32 reference (bf16 matmul inputs =>
    # slightly relaxed tolerance; accumulation is f32 so error stays ~1e-2)
    u_ref, i_ref = lightgcn_forward_ref(user_emb, item_emb, edge_index, num_layers)
    assert jnp.allclose(user_final, u_ref, atol=2e-2, rtol=2e-2)
    assert jnp.allclose(item_final, i_ref, atol=2e-2, rtol=2e-2)
    assert user_final.shape == (num_users, embedding_dim)
    assert item_final.shape == (num_items, embedding_dim)

    print("KERNEL_OK")
</pallas_src>

<mosaic_0001>
module attributes {stable_mosaic.version = 11 : i64} {
  func.func @_lightgcn_layer_kernel(%arg0: i32, %arg1: i32, %arg2: memref<256x256xbf16, #tpu.memory_space<vmem>>, %arg3: memref<256x128xbf16, #tpu.memory_space<vmem>>, %arg4: memref<256x128xf32, #tpu.memory_space<vmem>>, %arg5: memref<256x128xbf16, #tpu.memory_space<vmem>>, %arg6: memref<256x128xf32, #tpu.memory_space<vmem>>, %arg7: memref<256x128xf32, #tpu.memory_space<vmem>>) attributes {dimension_semantics = [#tpu.dimension_semantics<parallel>, #tpu.dimension_semantics<arbitrary>], iteration_bounds = array<i64: 1, 1>, scalar_prefetch = 0 : i64, scratch_operands = 1 : i64, tpu.core_type = #tpu.core_type<tc>, window_params = [{transform_indices = @transform_0, window_bounds = array<i64: 256, 256>}, {transform_indices = @transform_1, window_bounds = array<i64: 256, 128>}, {transform_indices = @transform_2, window_bounds = array<i64: 256, 128>}, {transform_indices = @transform_3, window_bounds = array<i64: 256, 128>}, {transform_indices = @transform_4, window_bounds = array<i64: 256, 128>}]} {
    %c0_i32 = arith.constant 0 : i32
    %0 = arith.cmpi eq, %arg1, %c0_i32 : i32
    %1 = arith.extui %0 : i1 to i32
    %c0_i32_0 = arith.constant 0 : i32
    %2 = arith.cmpi ne, %1, %c0_i32_0 : i32
    scf.if %2 {
      %cst_10 = arith.constant 0.000000e+00 : f32
      %12 = vector.broadcast %cst_10 : f32 to vector<256x128xf32>
      %c0_11 = arith.constant 0 : index
      %c0_12 = arith.constant 0 : index
      %13 = vector.load %arg7[%c0_11, %c0_12] : memref<256x128xf32, #tpu.memory_space<vmem>>, vector<256x128xf32>
      tpu.vector_store %arg7[%c0_11, %c0_12], %12 {strides = array<i32>} : memref<256x128xf32, #tpu.memory_space<vmem>>, vector<256x128xf32>,
    } else {
    }
    %c0 = arith.constant 0 : index
    %c0_1 = arith.constant 0 : index
    %3 = vector.load %arg7[%c0, %c0_1] : memref<256x128xf32, #tpu.memory_space<vmem>>, vector<256x128xf32>
    %c0_2 = arith.constant 0 : index
    %c0_3 = arith.constant 0 : index
    %4 = vector.load %arg2[%c0_2, %c0_3] : memref<256x256xbf16, #tpu.memory_space<vmem>>, vector<256x256xbf16>
    %c0_4 = arith.constant 0 : index
    %c0_5 = arith.constant 0 : index
    %5 = vector.load %arg3[%c0_4, %c0_5] : memref<256x128xbf16, #tpu.memory_space<vmem>>, vector<256x128xbf16>
    %cst = arith.constant dense<0.000000e+00> : vector<256x128xf32>
    %6 = tpu.matmul %4, %5, %cst {dimension_numbers = #tpu.dot_dimension_numbers<[1], [0], [0], [1], [0, 0, 1, 1], [], []>} : vector<256x256xbf16>, vector<256x128xbf16>, vector<256x128xf32> -> vector<256x128xf32>
    %7 = arith.addf %3, %6 : vector<256x128xf32>
    %c0_6 = arith.constant 0 : index
    %c0_7 = arith.constant 0 : index
    %8 = vector.load %arg7[%c0_6, %c0_7] : memref<256x128xf32, #tpu.memory_space<vmem>>, vector<256x128xf32>
    tpu.vector_store %arg7[%c0_6, %c0_7], %7 {strides = array<i32>} : memref<256x128xf32, #tpu.memory_space<vmem>>, vector<256x128xf32>,
    %c0_i32_8 = arith.constant 0 : i32
    %9 = arith.cmpi eq, %arg1, %c0_i32_8 : i32
    %10 = arith.extui %9 : i1 to i32
    %c0_i32_9 = arith.constant 0 : i32
    %11 = arith.cmpi ne, %10, %c0_i32_9 : i32
    scf.if %11 {
      %c0_10 = arith.constant 0 : index
      %c0_11 = arith.constant 0 : index
      %12 = vector.load %arg7[%c0_10, %c0_11] : memref<256x128xf32, #tpu.memory_space<vmem>>, vector<256x128xf32>
      %13 = arith.truncf %12 : vector<256x128xf32> to vector<256x128xbf16>
      %c0_12 = arith.constant 0 : index
      %c0_13 = arith.constant 0 : index
      %14 = vector.load %arg5[%c0_12, %c0_13] : memref<256x128xbf16, #tpu.memory_space<vmem>>, vector<256x128xbf16>
      tpu.vector_store %arg5[%c0_12, %c0_13], %13 {strides = array<i32>} : memref<256x128xbf16, #tpu.memory_space<vmem>>, vector<256x128xbf16>,
      %c0_14 = arith.constant 0 : index
      %c0_15 = arith.constant 0 : index
      %15 = vector.load %arg4[%c0_14, %c0_15] : memref<256x128xf32, #tpu.memory_space<vmem>>, vector<256x128xf32>
      %16 = arith.addf %15, %12 : vector<256x128xf32>
      %c0_16 = arith.constant 0 : index
      %c0_17 = arith.constant 0 : index
      %17 = vector.load %arg6[%c0_16, %c0_17] : memref<256x128xf32, #tpu.memory_space<vmem>>, vector<256x128xf32>
      tpu.vector_store %arg6[%c0_16, %c0_17], %16 {strides = array<i32>} : memref<256x128xf32, #tpu.memory_space<vmem>>, vector<256x128xf32>,
    } else {
    }
    return
  }
  func.func @transform_0(%arg0: i32, %arg1: i32) -> (i32, i32) {
    %c0_i32 = arith.constant 0 : i32
    return %arg0, %arg1 : i32, i32
  }
  func.func @transform_1(%arg0: i32, %arg1: i32) -> (i32, i32) {
    %c0_i32 = arith.constant 0 : i32
    %c0_i32_0 = arith.constant 0 : i32
    return %arg1, %c0_i32 : i32, i32
  }
  func.func @transform_2(%arg0: i32, %arg1: i32) -> (i32, i32) {
    %c0_i32 = arith.constant 0 : i32
    %c0_i32_0 = arith.constant 0 : i32
    return %arg0, %c0_i32 : i32, i32
  }
  func.func @transform_3(%arg0: i32, %arg1: i32) -> (i32, i32) {
    %c0_i32 = arith.constant 0 : i32
    %c0_i32_0 = arith.constant 0 : i32
    return %arg0, %c0_i32 : i32, i32
  }
  func.func @transform_4(%arg0: i32, %arg1: i32) -> (i32, i32) {
    %c0_i32 = arith.constant 0 : i32
    %c0_i32_0 = arith.constant 0 : i32
    return %arg0, %c0_i32 : i32, i32
  }
}

module attributes {stable_mosaic.version = 11 : i64} {
  func.func @_lightgcn_layer_kernel(%arg0: i32, %arg1: i32, %arg2: memref<256x256xbf16, #tpu.memory_space<vmem>>, %arg3: memref<256x128xbf16, #tpu.memory_space<vmem>>, %arg4: memref<256x128xf32, #tpu.memory_space<vmem>>, %arg5: memref<256x128xbf16, #tpu.memory_space<vmem>>, %arg6: memref<256x128xf32, #tpu.memory_space<vmem>>, %arg7: memref<256x128xf32, #tpu.memory_space<vmem>>) attributes {dimension_semantics = [#tpu.dimension_semantics<parallel>, #tpu.dimension_semantics<arbitrary>], iteration_bounds = array<i64: 1, 1>, scalar_prefetch = 0 : i64, scratch_operands = 1 : i64, tpu.core_type = #tpu.core_type<tc>, window_params = [{transform_indices = @transform_0, window_bounds = array<i64: 256, 256>}, {transform_indices = @transform_1, window_bounds = array<i64: 256, 128>}, {transform_indices = @transform_2, window_bounds = array<i64: 256, 128>}, {transform_indices = @transform_3, window_bounds = array<i64: 256, 128>}, {transform_indices = @transform_4, window_bounds = array<i64: 256, 128>}]} {
    %c0_i32 = arith.constant 0 : i32
    %0 = arith.cmpi eq, %arg1, %c0_i32 : i32
    %1 = arith.extui %0 : i1 to i32
    %c0_i32_0 = arith.constant 0 : i32
    %2 = arith.cmpi ne, %1, %c0_i32_0 : i32
    scf.if %2 {
      %cst_10 = arith.constant 0.000000e+00 : f32
      %12 = vector.broadcast %cst_10 : f32 to vector<256x128xf32>
      %c0_11 = arith.constant 0 : index
      %c0_12 = arith.constant 0 : index
      %13 = vector.load %arg7[%c0_11, %c0_12] : memref<256x128xf32, #tpu.memory_space<vmem>>, vector<256x128xf32>
      tpu.vector_store %arg7[%c0_11, %c0_12], %12 {strides = array<i32>} : memref<256x128xf32, #tpu.memory_space<vmem>>, vector<256x128xf32>,
    } else {
    }
    %c0 = arith.constant 0 : index
    %c0_1 = arith.constant 0 : index
    %3 = vector.load %arg7[%c0, %c0_1] : memref<256x128xf32, #tpu.memory_space<vmem>>, vector<256x128xf32>
    %c0_2 = arith.constant 0 : index
    %c0_3 = arith.constant 0 : index
    %4 = vector.load %arg2[%c0_2, %c0_3] : memref<256x256xbf16, #tpu.memory_space<vmem>>, vector<256x256xbf16>
    %c0_4 = arith.constant 0 : index
    %c0_5 = arith.constant 0 : index
    %5 = vector.load %arg3[%c0_4, %c0_5] : memref<256x128xbf16, #tpu.memory_space<vmem>>, vector<256x128xbf16>
    %cst = arith.constant dense<0.000000e+00> : vector<256x128xf32>
    %6 = tpu.matmul %4, %5, %cst {dimension_numbers = #tpu.dot_dimension_numbers<[1], [0], [0], [1], [0, 0, 1, 1], [], []>} : vector<256x256xbf16>, vector<256x128xbf16>, vector<256x128xf32> -> vector<256x128xf32>
    %7 = arith.addf %3, %6 : vector<256x128xf32>
    %c0_6 = arith.constant 0 : index
    %c0_7 = arith.constant 0 : index
    %8 = vector.load %arg7[%c0_6, %c0_7] : memref<256x128xf32, #tpu.memory_space<vmem>>, vector<256x128xf32>
    tpu.vector_store %arg7[%c0_6, %c0_7], %7 {strides = array<i32>} : memref<256x128xf32, #tpu.memory_space<vmem>>, vector<256x128xf32>,
    %c0_i32_8 = arith.constant 0 : i32
    %9 = arith.cmpi eq, %arg1, %c0_i32_8 : i32
    %10 = arith.extui %9 : i1 to i32
    %c0_i32_9 = arith.constant 0 : i32
    %11 = arith.cmpi ne, %10, %c0_i32_9 : i32
    scf.if %11 {
      %c0_10 = arith.constant 0 : index
      %c0_11 = arith.constant 0 : index
      %12 = vector.load %arg7[%c0_10, %c0_11] : memref<256x128xf32, #tpu.memory_space<vmem>>, vector<256x128xf32>
      %13 = arith.truncf %12 : vector<256x128xf32> to vector<256x128xbf16>
      %c0_12 = arith.constant 0 : index
      %c0_13 = arith.constant 0 : index
      %14 = vector.load %arg5[%c0_12, %c0_13] : memref<256x128xbf16, #tpu.memory_space<vmem>>, vector<256x128xbf16>
      tpu.vector_store %arg5[%c0_12, %c0_13], %13 {strides = array<i32>} : memref<256x128xbf16, #tpu.memory_space<vmem>>, vector<256x128xbf16>,
      %c0_14 = arith.constant 0 : index
      %c0_15 = arith.constant 0 : index
      %15 = vector.load %arg4[%c0_14, %c0_15] : memref<256x128xf32, #tpu.memory_space<vmem>>, vector<256x128xf32>
      %16 = arith.addf %15, %12 : vector<256x128xf32>
      %cst_16 = arith.constant 2.500000e-01 : f32
      %17 = vector.broadcast %cst_16 : f32 to vector<256x128xf32>
      %18 = arith.mulf %16, %17 : vector<256x128xf32>
      %c0_17 = arith.constant 0 : index
      %c0_18 = arith.constant 0 : index
      %19 = vector.load %arg6[%c0_17, %c0_18] : memref<256x128xf32, #tpu.memory_space<vmem>>, vector<256x128xf32>
      tpu.vector_store %arg6[%c0_17, %c0_18], %18 {strides = array<i32>} : memref<256x128xf32, #tpu.memory_space<vmem>>, vector<256x128xf32>,
    } else {
    }
    return
  }
  func.func @transform_0(%arg0: i32, %arg1: i32) -> (i32, i32) {
    %c0_i32 = arith.constant 0 : i32
    return %arg0, %arg1 : i32, i32
  }
  func.func @transform_1(%arg0: i32, %arg1: i32) -> (i32, i32) {
    %c0_i32 = arith.constant 0 : i32
    %c0_i32_0 = arith.constant 0 : i32
    return %arg1, %c0_i32 : i32, i32
  }
  func.func @transform_2(%arg0: i32, %arg1: i32) -> (i32, i32) {
    %c0_i32 = arith.constant 0 : i32
    %c0_i32_0 = arith.constant 0 : i32
    return %arg0, %c0_i32 : i32, i32
  }
  func.func @transform_3(%arg0: i32, %arg1: i32) -> (i32, i32) {
    %c0_i32 = arith.constant 0 : i32
    %c0_i32_0 = arith.constant 0 : i32
    return %arg0, %c0_i32 : i32, i32
  }
  func.func @transform_4(%arg0: i32, %arg1: i32) -> (i32, i32) {
    %c0_i32 = arith.constant 0 : i32
    %c0_i32_0 = arith.constant 0 : i32
    return %arg0, %c0_i32 : i32, i32
  }
}

</mosaic_0001>

<bundles_post_ra>
// kernel: lightgcn_propagate.5
= control target key start
LH: loop header
LB: loop body
LE: loop exit
PB: predicated region body
PF: predicated region fallthrough
CT: control target
= control target key end

     0   :  { %s1765_s0 = inlined_call_operand.vmem [shape: bf16[256,256], index: 0, kind: input, shape index: {}]   ;;  %s1766_s1 = inlined_call_operand.vmem [shape: bf16[256,128], index: 1, kind: input, shape index: {}]   ;;  %s1767_s2 = inlined_call_operand.vmem [shape: f32[256,128], index: 2, kind: input, shape index: {}, may-alias: {2,4}]   ;;  %s1768_s3 = inlined_call_operand.hbm [shape: bf16[256,128], index: 3, kind: output, shape index: {0}]   ;;  %s1769_s4 = inlined_call_operand.vmem [shape: f32[256,128], index: 4, kind: output, shape index: {1}, may-alias: {2,4}]  }
   0x1   :  { %v1312_v0 = vld [vmem:[%s1766_s1 + $0x78] sm:$0xff]   ;;  %v1314_v2 = vld [vmem:[%s1766_s1 + $0x70] sm:$0xff]   ;;  %v1316_v4 = vld [vmem:[%s1766_s1 + $0x68] sm:$0xff]  }
   0x2   :  { %v1313_v1 = vld [vmem:[%s1766_s1 + $0x38] sm:$0xff]   ;;  %1181 = vmatprep.subr.bf16.mxu0 %v1312_v0  ;;  %1293 = vmatprep.subr.bf16.mxu1 %v1312_v0  ;;  %v1315_v3 = vld [vmem:[%s1766_s1 + $0x30] sm:$0xff]   ;;  %v1317_v5 = vld [vmem:[%s1766_s1 + $0x28] sm:$0xff]  }
   0x3   :  { %1182 = vmatpush3.bf16.msra.mxu0 %v1313_v1  ;;  %1301 = vmatpush3.bf16.msra.mxu1 %v1313_v1  ;;  %v1318_v6 = vld [vmem:[%s1766_s1 + $0x60] sm:$0xff]   ;;  %v1320_v8 = vld [vmem:[%s1766_s1 + $0x58] sm:$0xff]   ;;  %v1322_v10 = vld [vmem:[%s1766_s1 + $0x50] sm:$0xff]  }
   0x4   :  { %1183 = vmatprep.subr.bf16.mxu0 %v1314_v2  ;;  %1294 = vmatprep.subr.bf16.mxu1 %v1314_v2  ;;  %v1319_v7 = vld [vmem:[%s1766_s1 + $0x20] sm:$0xff]   ;;  %v1321_v9 = vld [vmem:[%s1766_s1 + $0x18] sm:$0xff]   ;;  %v1323_v13 = vld [vmem:[%s1766_s1 + $0x10] sm:$0xff]  }
   0x5   :  { %v1330_v11 = vld [vmem:[%s1765_s0 + $0x4] ss:$8 sps:$4 sm:$0xff]   ;;  %v1328_v18 = vld [vmem:[%s1765_s0] ss:$8 sps:$4 sm:$0xff]   ;;  %v1334_v20 = vld [vmem:[%s1765_s0 + $0x14] ss:$8 sps:$4 sm:$0xff]  }
   0x6   :  { %v1333_v12 = vld [vmem:[%s1765_s0 + $0x84] ss:$8 sps:$4 sm:$0xff]   ;;  %438 = vmatprep.mubr.bf16.mxu0 %v1330_v11  ;;  %v1331_v19 = vld [vmem:[%s1765_s0 + $0x80] ss:$8 sps:$4 sm:$0xff]   ;;  %v1336_v21 = vld [vmem:[%s1765_s0 + $0x94] ss:$8 sps:$4 sm:$0xff]  }
   0x7   :  { %1184 = vmatpush3.bf16.msra.mxu0 %v1315_v3  ;;  %1302 = vmatpush3.bf16.msra.mxu1 %v1315_v3  ;;  %v1324_v14 = vld [vmem:[%s1766_s1 + $0x48] sm:$0xff]   ;;  %v1326_v16 = vld [vmem:[%s1766_s1 + $0x40] sm:$0xff]  }
   0x8   :  { %1185 = vmatprep.subr.bf16.mxu0 %v1316_v4  ;;  %1295 = vmatprep.subr.bf16.mxu1 %v1316_v4  ;;  %v1325_v15 = vld [vmem:[%s1766_s1 + $0x8] sm:$0xff]   ;;  %v1327_v17 = vld [vmem:[%s1766_s1] sm:$0xff]  }
   0x9   :  { %502 = vmatprep.mubr.bf16.mxu1 %v1333_v12 }
   0xb   :  { %1186 = vmatpush3.bf16.msra.mxu0 %v1317_v5  ;;  %1303 = vmatpush3.bf16.msra.mxu1 %v1317_v5 }
   0xc   :  { %1187 = vmatprep.subr.bf16.mxu0 %v1318_v6  ;;  %1296 = vmatprep.subr.bf16.mxu1 %v1318_v6 }
   0xf   :  { %1188 = vmatpush3.bf16.msra.mxu0 %v1319_v7  ;;  %1304 = vmatpush3.bf16.msra.mxu1 %v1319_v7 }
  0x10   :  { %1189 = vmatprep.subr.bf16.mxu0 %v1320_v8  ;;  %1297 = vmatprep.subr.bf16.mxu1 %v1320_v8 }
  0x13   :  { %1190 = vmatpush3.bf16.msra.mxu0 %v1321_v9  ;;  %1305 = vmatpush3.bf16.msra.mxu1 %v1321_v9 }
  0x14   :  { %1191 = vmatprep.subr.bf16.mxu0 %v1322_v10  ;;  %1298 = vmatprep.subr.bf16.mxu1 %v1322_v10 }
  0x17   :  { %1192 = vmatpush3.bf16.msra.mxu0 %v1323_v13  ;;  %1306 = vmatpush3.bf16.msra.mxu1 %v1323_v13 }
  0x18   :  { %1193 = vmatprep.subr.bf16.mxu0 %v1324_v14  ;;  %1299 = vmatprep.subr.bf16.mxu1 %v1324_v14 }
  0x1b   :  { %1194 = vmatpush3.bf16.msra.mxu0 %v1325_v15  ;;  %1307 = vmatpush3.bf16.msra.mxu1 %v1325_v15 }
  0x1c   :  { %1195 = vmatprep.subr.bf16.mxu0 %v1326_v16  ;;  %1300 = vmatprep.subr.bf16.mxu1 %v1326_v16 }
  0x1f   :  { %1196 = vmatpush3.bf16.msra.mxu0 %v1327_v17  ;;  %1308 = vmatpush3.bf16.msra.mxu1 %v1327_v17 }
  0x22   :  { %439 = vmatmul.mubr.bf16.vlgmr.msra.gmra.mxu0 %v1328_v18  ;;  %503 = vmatmul.mubr.bf16.vlgmr.msra.gmra.mxu1 %v1331_v19 }
  0x23   :  { %446 = vmatprep.mubr.bf16.mxu0 %v1334_v20  ;;  %510 = vmatprep.mubr.bf16.mxu1 %v1336_v21 }
  0x24   :  { %10 = vsyncpa [#allocation4], 0  ;;  %v1338_v22 = vld [vmem:[%s1765_s0 + $0x10] ss:$8 sps:$4 sm:$0xff]   ;;  %v1340_v24 = vld [vmem:[%s1765_s0 + $0x24] ss:$8 sps:$4 sm:$0xff]  }
  0x25   :  { %v1339_v23 = vld [vmem:[%s1765_s0 + $0x90] ss:$8 sps:$4 sm:$0xff]   ;;  %v1342_v25 = vld [vmem:[%s1765_s0 + $0xa4] ss:$8 sps:$4 sm:$0xff]   ;;  %v1344_v26 = vld [vmem:[%s1765_s0 + $0x20] ss:$8 sps:$4 sm:$0xff]  }
  0x26   :  { %v1345_v27 = vld [vmem:[%s1765_s0 + $0xa0] ss:$8 sps:$4 sm:$0xff]   ;;  %v1346_v28 = vld [vmem:[%s1765_s0 + $0x34] ss:$8 sps:$4 sm:$0xff]   ;;  %v1350_v30 = vld [vmem:[%s1765_s0 + $0x30] ss:$8 sps:$4 sm:$0xff]  }
  0x27   :  { %v1348_v29 = vld [vmem:[%s1765_s0 + $0xb4] ss:$8 sps:$4 sm:$0xff]   ;;  %v1351_v31 = vld [vmem:[%s1765_s0 + $0xb0] ss:$8 sps:$4 sm:$0xff]   ;;  %v1352_v32 = vld [vmem:[%s1765_s0 + $0x44] ss:$8 sps:$4 sm:$0xff]  }
  0x28   :  { %v1354_v33 = vld [vmem:[%s1765_s0 + $0xc4] ss:$8 sps:$4 sm:$0xff]   ;;  %v1356_v34 = vld [vmem:[%s1765_s0 + $0x40] ss:$8 sps:$4 sm:$0xff]   ;;  %v1358_v36 = vld [vmem:[%s1765_s0 + $0x54] ss:$8 sps:$4 sm:$0xff]  }
  0x29   :  { %v1357_v35 = vld [vmem:[%s1765_s0 + $0xc0] ss:$8 sps:$4 sm:$0xff]   ;;  %v1360_v37 = vld [vmem:[%s1765_s0 + $0xd4] ss:$8 sps:$4 sm:$0xff]   ;;  %v1362_v38 = vld [vmem:[%s1765_s0 + $0x50] ss:$8 sps:$4 sm:$0xff]  }
  0x2a   :  { %447 = vmatmul.mubr.bf16.gmra.mxu0 %v1338_v22  ;;  %511 = vmatmul.mubr.bf16.gmra.mxu1 %v1339_v23  ;;  %v1363_v39 = vld [vmem:[%s1765_s0 + $0xd0] ss:$8 sps:$4 sm:$0xff]   ;;  %v1364_v40 = vld [vmem:[%s1765_s0 + $0x64] ss:$8 sps:$4 sm:$0xff]   ;;  %v1368_v42 = vld [vmem:[%s1765_s0 + $0x60] ss:$8 sps:$4 sm:$0xff]  }
  0x2b   :  { %454 = vmatprep.mubr.bf16.mxu0 %v1340_v24  ;;  %518 = vmatprep.mubr.bf16.mxu1 %v1342_v25  ;;  %v1366_v41 = vld [vmem:[%s1765_s0 + $0xe4] ss:$8 sps:$4 sm:$0xff]   ;;  %v1369_v43 = vld [vmem:[%s1765_s0 + $0xe0] ss:$8 sps:$4 sm:$0xff]   ;;  %v1370_v44 = vld [vmem:[%s1765_s0 + $0x74] ss:$8 sps:$4 sm:$0xff]  }
  0x2c   :  { %v1372_v45 = vld [vmem:[%s1765_s0 + $0xf4] ss:$8 sps:$4 sm:$0xff]   ;;  %v1374_v46 = vld [vmem:[%s1765_s0 + $0x70] ss:$8 sps:$4 sm:$0xff]   ;;  %v826_v51 = vld [vmem:[%s1767_s2] sm:$0xff] }
  0x2d   :  { %v1375_v47 = vld [vmem:[%s1765_s0 + $0xf0] ss:$8 sps:$4 sm:$0xff]   ;;  %v842_v53 = vld [vmem:[%s1767_s2 + $0x80] sm:$0xff]  ;;  %v827_v61 = vld [vmem:[%s1767_s2 + $0x8] sm:$0xff]  ;;  %s1398_s0 = smov [#allocation3]  }
  0x2e   :  { %v843_v63 = vld [vmem:[%s1767_s2 + $0x88] sm:$0xff]  ;;  %s959_s8 = sshll.u32 %s1398_s0, 4  ;;  %s960_s8 = int_to_ptr.vmem [resolvable:$true] %s959_s8 }
  0x2f   :  { %p1381_p1 = scmp.lt.s32.totalorder %s960_s8, %s960_s8 }
  0x32   :  { %455 = vmatmul.mubr.bf16.gmra.mxu0 %v1344_v26  ;;  %519 = vmatmul.mubr.bf16.gmra.mxu1 %v1345_v27 }
  0x33   :  { %462 = vmatprep.mubr.bf16.mxu0 %v1346_v28  ;;  %526 = vmatprep.mubr.bf16.mxu1 %v1348_v29 }
  0x3a   :  { %463 = vmatmul.mubr.bf16.gmra.mxu0 %v1350_v30  ;;  %527 = vmatmul.mubr.bf16.gmra.mxu1 %v1351_v31 }
  0x3b   :  { %470 = vmatprep.mubr.bf16.mxu0 %v1352_v32  ;;  %534 = vmatprep.mubr.bf16.mxu1 %v1354_v33 }
  0x42   :  { %471 = vmatmul.mubr.bf16.gmra.mxu0 %v1356_v34  ;;  %535 = vmatmul.mubr.bf16.gmra.mxu1 %v1357_v35 }
  0x43   :  { %478 = vmatprep.mubr.bf16.mxu0 %v1358_v36  ;;  %542 = vmatprep.mubr.bf16.mxu1 %v1360_v37 }
  0x4a   :  { %479 = vmatmul.mubr.bf16.gmra.mxu0 %v1362_v38  ;;  %543 = vmatmul.mubr.bf16.gmra.mxu1 %v1363_v39 }
  0x4b   :  { %486 = vmatprep.mubr.bf16.mxu0 %v1364_v40  ;;  %550 = vmatprep.mubr.bf16.mxu1 %v1366_v41 }
  0x52   :  { %487 = vmatmul.mubr.bf16.gmra.mxu0 %v1368_v42  ;;  %551 = vmatmul.mubr.bf16.gmra.mxu1 %v1369_v43 }
  0x53   :  { %494 = vmatprep.mubr.bf16.mxu0 %v1370_v44  ;;  %558 = vmatprep.mubr.bf16.mxu1 %v1372_v45 }
  0x5a   :  { %495 = vmatmul.mubr.bf16.gmra.mxu0 %v1374_v46  ;;  %559 = vmatmul.mubr.bf16.gmra.mxu1 %v1375_v47 }
  0xe2   :  { %v1197_v48 = vpop.f32.mrf.mxu0  ;;  %v1245_v49 = vpop.f32.mrf.mxu1 }
  0xe4   :  { %v1198_v50 = vpop.f32.mrf.mxu0  ;;  %v1246_v52 = vpop.f32.mrf.mxu1 }
  0xe5   :  { %v1199_v54 = vadd.f32 %v1198_v50, %v1197_v48  ;;  %v1247_v55 = vadd.f32 %v1246_v52, %v1245_v49 }
  0xe6   :  { %v1200_v56 = vpop.f32.mrf.mxu0  ;;  %v1248_v57 = vpop.f32.mrf.mxu1 }
  0xe7   :  { %v858_v58 = vadd.f32 %v1199_v54, %v826_v51  ;;  %v874_v59 = vadd.f32 %v1247_v55, %v842_v53 }
  0xe8   :  { %v1201_v60 = vpop.f32.mrf.mxu0  ;;  %v1249_v62 = vpop.f32.mrf.mxu1 }
  0xe9   :  { %v890_v0 = vmul.f32 0.25, %v858_v58  ;;  %v906_v1 = vmul.f32 0.25, %v874_v59  ;;  %v1202_v2 = vadd.f32 %v1201_v60, %v1200_v56  ;;  %v1250_v3 = vadd.f32 %v1249_v62, %v1248_v57 }
  0xea   :  { %v1203_v4 = vpop.f32.mrf.mxu0  ;;  %v1251_v5 = vpop.f32.mrf.mxu1 }
  0xeb   :  { %922 = vst [vmem:[%s1769_s4] sm:$0xff] %v890_v0  ;;  %938 = vst [vmem:[%s1769_s4 + $0x80] sm:$0xff] %v906_v1  ;;  %v1089_v6 = vpack.c.bf16 %v1202_v2, %v1199_v54  ;;  %v859_v7 = vadd.f32 %v1202_v2, %v827_v61  ;;  %v1129_v8 = vpack.c.bf16 %v1250_v3, %v1247_v55 }
  0xec   :  { %v875_v9 = vadd.f32 %v1250_v3, %v843_v63  ;;  %v1204_v10 = vpop.f32.mrf.mxu0  ;;  %v1252_v12 = vpop.f32.mrf.mxu1 }
  0xed   :  { %1090 = vst [vmem:[#allocation3] sm:$0xff] %v1089_v6   ;;  %v891_v14 = vmul.f32 0.25, %v859_v7  ;;  %1173 = vst [vmem:[#allocation3 + $0x40] sm:$0xff] %v1129_v8   ;;  %v1205_v16 = vadd.f32 %v1204_v10, %v1203_v4  ;;  %v1253_v17 = vadd.f32 %v1252_v12, %v1251_v5 }
  0xee   :  { %v907_v15 = vmul.f32 0.25, %v875_v9  ;;  %v1206_v18 = vpop.f32.mrf.mxu0  ;;  %v1254_v19 = vpop.f32.mrf.mxu1 }
  0xf0   :  { %v1207_v22 = vpop.f32.mrf.mxu0  ;;  %v1255_v24 = vpop.f32.mrf.mxu1 }
  0xf1   :  { %v1208_v28 = vadd.f32 %v1207_v22, %v1206_v18  ;;  %v1256_v29 = vadd.f32 %v1255_v24, %v1254_v19 }
  0xf2   :  { %v828_v11 = vld [vmem:[%s1767_s2 + $0x10] sm:$0xff]  ;;  %v1209_v30 = vpop.f32.mrf.mxu0  ;;  %v1257_v31 = vpop.f32.mrf.mxu1 }
  0xf3   :  { %v844_v13 = vld [vmem:[%s1767_s2 + $0x90] sm:$0xff]  ;;  %v860_v20 = vadd.f32 %v1205_v16, %v828_v11  ;;  %v1094_v32 = vpack.c.bf16 %v1208_v28, %v1205_v16  ;;  %v1134_v34 = vpack.c.bf16 %v1256_v29, %v1253_v17 }
  0xf4   :  { %923 = vst [vmem:[%s1769_s4 + $0x8] sm:$0xff] %v891_v14  ;;  %939 = vst [vmem:[%s1769_s4 + $0x88] sm:$0xff] %v907_v15  ;;  %v876_v21 = vadd.f32 %v1253_v17, %v844_v13  ;;  %v1210_v36 = vpop.f32.mrf.mxu0  ;;  %v1258_v38 = vpop.f32.mrf.mxu1 }
  0xf5   :  { %v892_v26 = vmul.f32 0.25, %v860_v20  ;;  %1166 = vst [vmem:[#allocation3 + $0x8] sm:$0xff] %v1094_v32   ;;  %1174 = vst [vmem:[#allocation3 + $0x48] sm:$0xff] %v1134_v34   ;;  %v1211_v42 = vadd.f32 %v1210_v36, %v1209_v30  ;;  %v1259_v43 = vadd.f32 %v1258_v38, %v1257_v31 }
  0xf6   :  { %v908_v27 = vmul.f32 0.25, %v876_v21  ;;  %v1212_v44 = vpop.f32.mrf.mxu0  ;;  %v1260_v45 = vpop.f32.mrf.mxu1 }
  0xf8   :  { %v1213_v48 = vpop.f32.mrf.mxu0  ;;  %v1261_v50 = vpop.f32.mrf.mxu1 }
  0xf9   :  { %v1214_v54 = vadd.f32 %v1213_v48, %v1212_v44  ;;  %v1262_v55 = vadd.f32 %v1261_v50, %v1260_v45 }
  0xfa   :  { %v1215_v56 = vpop.f32.mrf.mxu0  ;;  %v1263_v57 = vpop.f32.mrf.mxu1 }
  0xfb   :  { %v829_v23 = vld [vmem:[%s1767_s2 + $0x18] sm:$0xff]  ;;  %v1099_v58 = vpack.c.bf16 %v1214_v54, %v1211_v42  ;;  %v1139_v60 = vpack.c.bf16 %v1262_v55, %v1259_v43 }
  0xfc   :  { %v845_v25 = vld [vmem:[%s1767_s2 + $0x98] sm:$0xff]  ;;  %v861_v33 = vadd.f32 %v1208_v28, %v829_v23  ;;  %v1216_v62 = vpop.f32.mrf.mxu0  ;;  %v1264_v0 = vpop.f32.mrf.mxu1 }
  0xfd   :  { %924 = vst [vmem:[%s1769_s4 + $0x10] sm:$0xff] %v892_v26  ;;  %940 = vst [vmem:[%s1769_s4 + $0x90] sm:$0xff] %v908_v27  ;;  %v877_v35 = vadd.f32 %v1256_v29, %v845_v25  ;;  %v1217_v4 = vadd.f32 %v1216_v62, %v1215_v56  ;;  %v1265_v5 = vadd.f32 %v1264_v0, %v1263_v57 }
  0xfe   :  { %v893_v40 = vmul.f32 0.25, %v861_v33  ;;  %1167 = vst [vmem:[#allocation3 + $0x10] sm:$0xff] %v1099_v58   ;;  %1175 = vst [vmem:[#allocation3 + $0x50] sm:$0xff] %v1139_v60   ;;  %v1218_v6 = vpop.f32.mrf.mxu0  ;;  %v1266_v7 = vpop.f32.mrf.mxu1 }
  0xff   :  { %v909_v41 = vmul.f32 0.25, %v877_v35 }
 0x100   :  { %v1219_v10 = vpop.f32.mrf.mxu0  ;;  %v1267_v12 = vpop.f32.mrf.mxu1 }
 0x101   :  { %v1220_v16 = vadd.f32 %v1219_v10, %v1218_v6  ;;  %v1268_v17 = vadd.f32 %v1267_v12, %v1266_v7 }
 0x102   :  { %v1221_v18 = vpop.f32.mrf.mxu0  ;;  %v1269_v19 = vpop.f32.mrf.mxu1 }
 0x103   :  { %v1104_v20 = vpack.c.bf16 %v1220_v16, %v1217_v4  ;;  %v1144_v22 = vpack.c.bf16 %v1268_v17, %v1265_v5 }
 0x104   :  { %v830_v37 = vld [vmem:[%s1767_s2 + $0x20] sm:$0xff]  ;;  %v1222_v24 = vpop.f32.mrf.mxu0  ;;  %v1270_v26 = vpop.f32.mrf.mxu1 }
 0x105   :  { %v846_v39 = vld [vmem:[%s1767_s2 + $0xa0] sm:$0xff]  ;;  %v862_v46 = vadd.f32 %v1211_v42, %v830_v37  ;;  %1168 = vst [vmem:[#allocation3 + $0x18] sm:$0xff] %v1104_v20   ;;  %1176 = vst [vmem:[#allocation3 + $0x58] sm:$0xff] %v1144_v22   ;;  %v1223_v30 = vadd.f32 %v1222_v24, %v1221_v18  ;;  %v1271_v31 = vadd.f32 %v1270_v26, %v1269_v19 }
 0x106   :  { %925 = vst [vmem:[%s1769_s4 + $0x18] sm:$0xff] %v893_v40  ;;  %941 = vst [vmem:[%s1769_s4 + $0x98] sm:$0xff] %v909_v41  ;;  %v878_v47 = vadd.f32 %v1259_v43, %v846_v39  ;;  %v1224_v32 = vpop.f32.mrf.mxu0  ;;  %v1272_v33 = vpop.f32.mrf.mxu1 }
 0x107   :  { %v894_v52 = vmul.f32 0.25, %v862_v46 }
 0x108   :  { %v910_v53 = vmul.f32 0.25, %v878_v47  ;;  %v1225_v36 = vpop.f32.mrf.mxu0  ;;  %v1273_v38 = vpop.f32.mrf.mxu1 }
 0x109   :  { %v1226_v42 = vadd.f32 %v1225_v36, %v1224_v32  ;;  %v1274_v43 = vadd.f32 %v1273_v38, %v1272_v33 }
 0x10a   :  { %v1227_v44 = vpop.f32.mrf.mxu0  ;;  %v1275_v45 = vpop.f32.mrf.mxu1 }
 0x10b   :  { %v1109_v46 = vpack.c.bf16 %v1226_v42, %v1223_v30  ;;  %v1149_v48 = vpack.c.bf16 %v1274_v43, %v1271_v31 }
 0x10c   :  { %v1228_v50 = vpop.f32.mrf.mxu0 }
 0x10d   :  { %v831_v49 = vld [vmem:[%s1767_s2 + $0x28] sm:$0xff]  ;;  %1169 = vst [vmem:[#allocation3 + $0x20] sm:$0xff] %v1109_v46   ;;  %1177 = vst [vmem:[#allocation3 + $0x60] sm:$0xff] %v1149_v48   ;;  %v1229_v56 = vadd.f32 %v1228_v50, %v1227_v44 }
 0x10e   :  { %v847_v51 = vld [vmem:[%s1767_s2 + $0xa8] sm:$0xff]  ;;  %v863_v59 = vadd.f32 %v1214_v54, %v831_v49  ;;  %v1230_v58 = vpop.f32.mrf.mxu0 }
 0x10f   :  { %926 = vst [vmem:[%s1769_s4 + $0x20] sm:$0xff] %v894_v52  ;;  %942 = vst [vmem:[%s1769_s4 + $0xa0] sm:$0xff] %v910_v53  ;;  %v879_v61 = vadd.f32 %v1262_v55, %v847_v51  ;;  %v1276_v52 = vpop.f32.mrf.mxu1 }
 0x110   :  { %v895_v2 = vmul.f32 0.25, %v863_v59  ;;  %v1277_v57 = vadd.f32 %v1276_v52, %v1275_v45  ;;  %v1231_v62 = vpop.f32.mrf.mxu0 }
 0x111   :  { %v911_v3 = vmul.f32 0.25, %v879_v61  ;;  %v1278_v59 = vpop.f32.mrf.mxu1 }
 0x112   :  { %v1233_v6 = vpop.f32.mrf.mxu0 }
 0x113   :  { %v1279_v0 = vpop.f32.mrf.mxu1 }
 0x114   :  { %v1234_v12 = vpop.f32.mrf.mxu0 }
 0x115   :  { %v1281_v7 = vpop.f32.mrf.mxu1  ;;  %v1235_v18 = vadd.f32 %v1234_v12, %v1233_v6 }
 0x116   :  { %v832_v63 = vld [vmem:[%s1767_s2 + $0x30] sm:$0xff]  ;;  %v1236_v20 = vpop.f32.mrf.mxu0 }
 0x117   :  { %v848_v1 = vld [vmem:[%s1767_s2 + $0xb0] sm:$0xff]  ;;  %v864_v8 = vadd.f32 %v1217_v4, %v832_v63  ;;  %v1232_v4 = vadd.f32 %v1231_v62, %v1230_v58 }
 0x118   :  { %927 = vst [vmem:[%s1769_s4 + $0x28] sm:$0xff] %v895_v2  ;;  %943 = vst [vmem:[%s1769_s4 + $0xa8] sm:$0xff] %v911_v3  ;;  %v880_v9 = vadd.f32 %v1265_v5, %v848_v1  ;;  %v1280_v5 = vadd.f32 %v1279_v0, %v1278_v59  ;;  %v1237_v24 = vpop.f32.mrf.mxu0 }
 0x119   :  { %v896_v14 = vmul.f32 0.25, %v864_v8  ;;  %v1114_v8 = vpack.c.bf16 %v1232_v4, %v1229_v56 }
 0x11a   :  { %v912_v15 = vmul.f32 0.25, %v880_v9  ;;  %v1154_v10 = vpack.c.bf16 %v1280_v5, %v1277_v57  ;;  %v1239_v32 = vpop.f32.mrf.mxu0 }
 0x11b   :  { %1170 = vst [vmem:[#allocation3 + $0x28] sm:$0xff] %v1114_v8  }
 0x11c   :  { %1178 = vst [vmem:[#allocation3 + $0x68] sm:$0xff] %v1154_v10   ;;  %v1240_v38 = vpop.f32.mrf.mxu0 }
 0x11d   :  { %v1241_v44 = vadd.f32 %v1240_v38, %v1239_v32 }
 0x11e   :  { %v1242_v46 = vpop.f32.mrf.mxu0 }
 0x11f   :  { %v833_v11 = vld [vmem:[%s1767_s2 + $0x38] sm:$0xff] }
 0x120   :  { %v849_v13 = vld [vmem:[%s1767_s2 + $0xb8] sm:$0xff]  ;;  %v865_v21 = vadd.f32 %v1220_v16, %v833_v11  ;;  %v1243_v50 = vpop.f32.mrf.mxu0 }
 0x121   :  { %928 = vst [vmem:[%s1769_s4 + $0x30] sm:$0xff] %v896_v14  ;;  %944 = vst [vmem:[%s1769_s4 + $0xb0] sm:$0xff] %v912_v15  ;;  %v881_v23 = vadd.f32 %v1268_v17, %v849_v13  ;;  %v1282_v14 = vpop.f32.mrf.mxu1 }
 0x122   :  { %v897_v28 = vmul.f32 0.25, %v865_v21  ;;  %v1283_v19 = vadd.f32 %v1282_v14, %v1281_v7 }
 0x123   :  { %v913_v29 = vmul.f32 0.25, %v881_v23  ;;  %v1284_v21 = vpop.f32.mrf.mxu1 }
 0x125   :  { %v1285_v26 = vpop.f32.mrf.mxu1 }
 0x127   :  { %v1287_v33 = vpop.f32.mrf.mxu1 }
 0x128   :  { %v834_v25 = vld [vmem:[%s1767_s2 + $0x40] sm:$0xff] }
 0x129   :  { %v850_v27 = vld [vmem:[%s1767_s2 + $0xc0] sm:$0xff]  ;;  %v866_v34 = vadd.f32 %v1223_v30, %v834_v25  ;;  %v1238_v30 = vadd.f32 %v1237_v24, %v1236_v20 }
 0x12a   :  { %929 = vst [vmem:[%s1769_s4 + $0x38] sm:$0xff] %v897_v28  ;;  %945 = vst [vmem:[%s1769_s4 + $0xb8] sm:$0xff] %v913_v29  ;;  %v882_v35 = vadd.f32 %v1271_v31, %v850_v27  ;;  %v1286_v31 = vadd.f32 %v1285_v26, %v1284_v21 }
 0x12b   :  { %v898_v40 = vmul.f32 0.25, %v866_v34  ;;  %v1119_v34 = vpack.c.bf16 %v1238_v30, %v1235_v18 }
 0x12c   :  { %v914_v41 = vmul.f32 0.25, %v882_v35  ;;  %v1159_v36 = vpack.c.bf16 %v1286_v31, %v1283_v19 }
 0x12d   :  { %1171 = vst [vmem:[#allocation3 + $0x30] sm:$0xff] %v1119_v34  }
 0x12e   :  { %1179 = vst [vmem:[#allocation3 + $0x70] sm:$0xff] %v1159_v36  }
 0x131   :  { %v835_v37 = vld [vmem:[%s1767_s2 + $0x48] sm:$0xff] }
 0x132   :  { %v851_v39 = vld [vmem:[%s1767_s2 + $0xc8] sm:$0xff]  ;;  %v867_v47 = vadd.f32 %v1226_v42, %v835_v37 }
 0x133   :  { %930 = vst [vmem:[%s1769_s4 + $0x40] sm:$0xff] %v898_v40  ;;  %946 = vst [vmem:[%s1769_s4 + $0xc0] sm:$0xff] %v914_v41  ;;  %v883_v49 = vadd.f32 %v1274_v43, %v851_v39  ;;  %v1288_v40 = vpop.f32.mrf.mxu1 }
 0x134   :  { %v899_v54 = vmul.f32 0.25, %v867_v47  ;;  %v1289_v45 = vadd.f32 %v1288_v40, %v1287_v33 }
 0x135   :  { %v915_v55 = vmul.f32 0.25, %v883_v49  ;;  %v1290_v47 = vpop.f32.mrf.mxu1 }
 0x137   :  { %v1291_v52 = vpop.f32.mrf.mxu1 }
 0x13a   :  { %v836_v51 = vld [vmem:[%s1767_s2 + $0x50] sm:$0xff] }
 0x13b   :  { %v852_v53 = vld [vmem:[%s1767_s2 + $0xd0] sm:$0xff]  ;;  %v868_v60 = vadd.f32 %v1229_v56, %v836_v51  ;;  %v1244_v56 = vadd.f32 %v1243_v50, %v1242_v46 }
 0x13c   :  { %931 = vst [vmem:[%s1769_s4 + $0x48] sm:$0xff] %v899_v54  ;;  %947 = vst [vmem:[%s1769_s4 + $0xc8] sm:$0xff] %v915_v55  ;;  %v884_v61 = vadd.f32 %v1277_v57, %v852_v53  ;;  %v1292_v57 = vadd.f32 %v1291_v52, %v1290_v47 }
 0x13d   :  { %v900_v2 = vmul.f32 0.25, %v868_v60  ;;  %v1124_v58 = vpack.c.bf16 %v1244_v56, %v1241_v44 }
 0x13e   :  { %v916_v3 = vmul.f32 0.25, %v884_v61  ;;  %v1164_v60 = vpack.c.bf16 %v1292_v57, %v1289_v45 }
 0x13f   :  { %1172 = vst [vmem:[#allocation3 + $0x38] sm:$0xff] %v1124_v58  }
 0x140   :  { %1180 = vst [vmem:[#allocation3 + $0x78] sm:$0xff] %v1164_v60  }
 0x143   :  { %v837_v63 = vld [vmem:[%s1767_s2 + $0x58] sm:$0xff] }
 0x144   :  { %v853_v1 = vld [vmem:[%s1767_s2 + $0xd8] sm:$0xff]  ;;  %v869_v9 = vadd.f32 %v1232_v4, %v837_v63 }
 0x145   :  { %932 = vst [vmem:[%s1769_s4 + $0x50] sm:$0xff] %v900_v2  ;;  %948 = vst [vmem:[%s1769_s4 + $0xd0] sm:$0xff] %v916_v3  ;;  %v885_v11 = vadd.f32 %v1280_v5, %v853_v1 }
 0x146   :  { %v901_v16 = vmul.f32 0.25, %v869_v9 }
 0x147   :  { %v917_v17 = vmul.f32 0.25, %v885_v11 }
 0x14c   :  { %v838_v13 = vld [vmem:[%s1767_s2 + $0x60] sm:$0xff] }
 0x14d   :  { %v854_v15 = vld [vmem:[%s1767_s2 + $0xe0] sm:$0xff]  ;;  %v870_v22 = vadd.f32 %v1235_v18, %v838_v13 }
 0x14e   :  { %933 = vst [vmem:[%s1769_s4 + $0x58] sm:$0xff] %v901_v16  ;;  %949 = vst [vmem:[%s1769_s4 + $0xd8] sm:$0xff] %v917_v17  ;;  %v886_v23 = vadd.f32 %v1283_v19, %v854_v15 }
 0x14f   :  { %v902_v28 = vmul.f32 0.25, %v870_v22 }
 0x150   :  { %v918_v29 = vmul.f32 0.25, %v886_v23 }
 0x155   :  { %v839_v25 = vld [vmem:[%s1767_s2 + $0x68] sm:$0xff] }
 0x156   :  { %v855_v27 = vld [vmem:[%s1767_s2 + $0xe8] sm:$0xff]  ;;  %v871_v35 = vadd.f32 %v1238_v30, %v839_v25 }
 0x157   :  { %934 = vst [vmem:[%s1769_s4 + $0x60] sm:$0xff] %v902_v28  ;;  %950 = vst [vmem:[%s1769_s4 + $0xe0] sm:$0xff] %v918_v29  ;;  %v887_v37 = vadd.f32 %v1286_v31, %v855_v27 }
 0x158   :  { %v903_v42 = vmul.f32 0.25, %v871_v35 }
 0x159   :  { %v919_v43 = vmul.f32 0.25, %v887_v37 }
 0x15e   :  { %v840_v39 = vld [vmem:[%s1767_s2 + $0x70] sm:$0xff] }
 0x15f   :  { %v856_v41 = vld [vmem:[%s1767_s2 + $0xf0] sm:$0xff]  ;;  %v872_v48 = vadd.f32 %v1241_v44, %v840_v39 }
 0x160   :  { %935 = vst [vmem:[%s1769_s4 + $0x68] sm:$0xff] %v903_v42  ;;  %951 = vst [vmem:[%s1769_s4 + $0xe8] sm:$0xff] %v919_v43  ;;  %v888_v49 = vadd.f32 %v1289_v45, %v856_v41 }
 0x161   :  { %v904_v54 = vmul.f32 0.25, %v872_v48 }
 0x162   :  { %v920_v55 = vmul.f32 0.25, %v888_v49 }
 0x167   :  { %v841_v51 = vld [vmem:[%s1767_s2 + $0x78] sm:$0xff] }
 0x168   :  { %v857_v53 = vld [vmem:[%s1767_s2 + $0xf8] sm:$0xff]  ;;  %v873_v59 = vadd.f32 %v1244_v56, %v841_v51  ;;  %s1376_s2 = scalar_lea.vmem %s960_s8, 2048 }
 0x169   :  { %936 = vst [vmem:[%s1769_s4 + $0x70] sm:$0xff] %v904_v54  ;;  %952 = vst [vmem:[%s1769_s4 + $0xf0] sm:$0xff] %v920_v55  ;;  %v889_v61 = vadd.f32 %v1292_v57, %v857_v53  ;;  %p1377_p0 = scmp.ne.s32.totalorder %s960_s8, %s1376_s2  ;;  %p1382_p2 = scmp.lt.s32.totalorder %s1376_s2, %s1376_s2 }
 0x16a   :  { %v905_v62 = vmul.f32 0.25, %v873_v59 }
 0x16b   :  { %v921_v63 = vmul.f32 0.25, %v889_v61  ;;  %p1383_p3 = por %p1382_p2, %p1381_p1 }
 0x16d   :  { %p1384_p4 = pnand %p1383_p3, %p1377_p0 }
 0x16f   :  { %1387 = shalt.err (!%p1384_p4)
}
 0x170   :  { %s1399_s17 = smov 64   ;;  %s1400_s18 = smov 4   ;;  %937 = vst [vmem:[%s1769_s4 + $0x78] sm:$0xff] %v905_v62  ;;  %953 = vst [vmem:[%s1769_s4 + $0xf8] sm:$0xff] %v921_v63 }
 0x171   :  { %965 = dma.vmem_to_hbm [thread:$0]  %s960_s8, 2048, %s1768_s3, [#allocation4], %s1399_s17, %s1399_s17, %s1400_s18  }
 0x172   :  { %1396 = dma.done.wait [#allocation4], 2048  }
 0x173   :  { %1397 = vsyncadd [#allocation4], 4294965248 }
 0x174   :  { %973 = vsyncpa [#allocation4], 1 }

// kernel: lightgcn_propagate.3
= control target key start
LH: loop header
LB: loop body
LE: loop exit
PB: predicated region body
PF: predicated region fallthrough
CT: control target
= control target key end

     0   :  { %s1737_s1 = inlined_call_operand.vmem [shape: bf16[256,128], index: 1, kind: input, shape index: {}]   ;;  %s1738_s0 = inlined_call_operand.vmem [shape: bf16[256,256], index: 0, kind: input, shape index: {}]   ;;  %s1739_s2 = inlined_call_operand.vmem [shape: f32[256,128], index: 2, kind: input, shape index: {}, may-alias: {2,4}]   ;;  %s1740_s4 = inlined_call_operand.vmem [shape: f32[256,128], index: 4, kind: output, shape index: {1}, may-alias: {2,4}]   ;;  %s1741_s3 = inlined_call_operand.vmem [shape: bf16[256,128], index: 3, kind: output, shape index: {0}]  }
   0x1   :  { %v1264_v0 = vld [vmem:[%s1737_s1 + $0x78] sm:$0xff]   ;;  %v1266_v2 = vld [vmem:[%s1737_s1 + $0x70] sm:$0xff]   ;;  %v1268_v4 = vld [vmem:[%s1737_s1 + $0x68] sm:$0xff]  }
   0x2   :  { %v1265_v1 = vld [vmem:[%s1737_s1 + $0x38] sm:$0xff]   ;;  %1136 = vmatprep.subr.bf16.mxu0 %v1264_v0  ;;  %1248 = vmatprep.subr.bf16.mxu1 %v1264_v0  ;;  %v1267_v3 = vld [vmem:[%s1737_s1 + $0x30] sm:$0xff]   ;;  %v1269_v5 = vld [vmem:[%s1737_s1 + $0x28] sm:$0xff]  }
   0x3   :  { %1137 = vmatpush3.bf16.msra.mxu0 %v1265_v1  ;;  %1256 = vmatpush3.bf16.msra.mxu1 %v1265_v1  ;;  %v1270_v6 = vld [vmem:[%s1737_s1 + $0x60] sm:$0xff]   ;;  %v1272_v8 = vld [vmem:[%s1737_s1 + $0x58] sm:$0xff]   ;;  %v1274_v10 = vld [vmem:[%s1737_s1 + $0x50] sm:$0xff]  }
   0x4   :  { %1138 = vmatprep.subr.bf16.mxu0 %v1266_v2  ;;  %1249 = vmatprep.subr.bf16.mxu1 %v1266_v2  ;;  %v1271_v7 = vld [vmem:[%s1737_s1 + $0x20] sm:$0xff]   ;;  %v1273_v9 = vld [vmem:[%s1737_s1 + $0x18] sm:$0xff]   ;;  %v1275_v13 = vld [vmem:[%s1737_s1 + $0x10] sm:$0xff]  }
   0x5   :  { %v1282_v11 = vld [vmem:[%s1738_s0 + $0x4] ss:$8 sps:$4 sm:$0xff]   ;;  %v1280_v18 = vld [vmem:[%s1738_s0] ss:$8 sps:$4 sm:$0xff]   ;;  %v1286_v20 = vld [vmem:[%s1738_s0 + $0x14] ss:$8 sps:$4 sm:$0xff]  }
   0x6   :  { %v1285_v12 = vld [vmem:[%s1738_s0 + $0x84] ss:$8 sps:$4 sm:$0xff]   ;;  %437 = vmatprep.mubr.bf16.mxu0 %v1282_v11  ;;  %v1283_v19 = vld [vmem:[%s1738_s0 + $0x80] ss:$8 sps:$4 sm:$0xff]   ;;  %v1288_v21 = vld [vmem:[%s1738_s0 + $0x94] ss:$8 sps:$4 sm:$0xff]  }
   0x7   :  { %1139 = vmatpush3.bf16.msra.mxu0 %v1267_v3  ;;  %1257 = vmatpush3.bf16.msra.mxu1 %v1267_v3  ;;  %v1276_v14 = vld [vmem:[%s1737_s1 + $0x48] sm:$0xff]   ;;  %v1278_v16 = vld [vmem:[%s1737_s1 + $0x40] sm:$0xff]   ;;  %v1290_v22 = vld [vmem:[%s1738_s0 + $0x10] ss:$8 sps:$4 sm:$0xff]  }
   0x8   :  { %1140 = vmatprep.subr.bf16.mxu0 %v1268_v4  ;;  %1250 = vmatprep.subr.bf16.mxu1 %v1268_v4  ;;  %v1277_v15 = vld [vmem:[%s1737_s1 + $0x8] sm:$0xff]   ;;  %v1279_v17 = vld [vmem:[%s1737_s1] sm:$0xff]   ;;  %v1291_v23 = vld [vmem:[%s1738_s0 + $0x90] ss:$8 sps:$4 sm:$0xff]  }
   0x9   :  { %501 = vmatprep.mubr.bf16.mxu1 %v1285_v12  ;;  %v1292_v24 = vld [vmem:[%s1738_s0 + $0x24] ss:$8 sps:$4 sm:$0xff]   ;;  %v1296_v26 = vld [vmem:[%s1738_s0 + $0x20] ss:$8 sps:$4 sm:$0xff]   ;;  %v1298_v28 = vld [vmem:[%s1738_s0 + $0x34] ss:$8 sps:$4 sm:$0xff]  }
   0xa   :  { %v1294_v25 = vld [vmem:[%s1738_s0 + $0xa4] ss:$8 sps:$4 sm:$0xff]   ;;  %v1297_v27 = vld [vmem:[%s1738_s0 + $0xa0] ss:$8 sps:$4 sm:$0xff]   ;;  %v1300_v29 = vld [vmem:[%s1738_s0 + $0xb4] ss:$8 sps:$4 sm:$0xff]  }
   0xb   :  { %1141 = vmatpush3.bf16.msra.mxu0 %v1269_v5  ;;  %1258 = vmatpush3.bf16.msra.mxu1 %v1269_v5  ;;  %v1302_v30 = vld [vmem:[%s1738_s0 + $0x30] ss:$8 sps:$4 sm:$0xff]   ;;  %v1304_v32 = vld [vmem:[%s1738_s0 + $0x44] ss:$8 sps:$4 sm:$0xff]   ;;  %v1308_v34 = vld [vmem:[%s1738_s0 + $0x40] ss:$8 sps:$4 sm:$0xff]  }
   0xc   :  { %1142 = vmatprep.subr.bf16.mxu0 %v1270_v6  ;;  %1251 = vmatprep.subr.bf16.mxu1 %v1270_v6  ;;  %v1303_v31 = vld [vmem:[%s1738_s0 + $0xb0] ss:$8 sps:$4 sm:$0xff]   ;;  %v1306_v33 = vld [vmem:[%s1738_s0 + $0xc4] ss:$8 sps:$4 sm:$0xff]   ;;  %v1309_v35 = vld [vmem:[%s1738_s0 + $0xc0] ss:$8 sps:$4 sm:$0xff]  }
   0xd   :  { %v1310_v36 = vld [vmem:[%s1738_s0 + $0x54] ss:$8 sps:$4 sm:$0xff]   ;;  %v1314_v38 = vld [vmem:[%s1738_s0 + $0x50] ss:$8 sps:$4 sm:$0xff]   ;;  %v1316_v40 = vld [vmem:[%s1738_s0 + $0x64] ss:$8 sps:$4 sm:$0xff]  }
   0xe   :  { %v1312_v37 = vld [vmem:[%s1738_s0 + $0xd4] ss:$8 sps:$4 sm:$0xff]   ;;  %v1315_v39 = vld [vmem:[%s1738_s0 + $0xd0] ss:$8 sps:$4 sm:$0xff]   ;;  %v1318_v41 = vld [vmem:[%s1738_s0 + $0xe4] ss:$8 sps:$4 sm:$0xff]  }
   0xf   :  { %1143 = vmatpush3.bf16.msra.mxu0 %v1271_v7  ;;  %1259 = vmatpush3.bf16.msra.mxu1 %v1271_v7  ;;  %v1320_v42 = vld [vmem:[%s1738_s0 + $0x60] ss:$8 sps:$4 sm:$0xff]   ;;  %v1322_v44 = vld [vmem:[%s1738_s0 + $0x74] ss:$8 sps:$4 sm:$0xff]   ;;  %v1326_v46 = vld [vmem:[%s1738_s0 + $0x70] ss:$8 sps:$4 sm:$0xff]  }
  0x10   :  { %1144 = vmatprep.subr.bf16.mxu0 %v1272_v8  ;;  %1252 = vmatprep.subr.bf16.mxu1 %v1272_v8  ;;  %v1321_v43 = vld [vmem:[%s1738_s0 + $0xe0] ss:$8 sps:$4 sm:$0xff]   ;;  %v1324_v45 = vld [vmem:[%s1738_s0 + $0xf4] ss:$8 sps:$4 sm:$0xff]   ;;  %v1327_v47 = vld [vmem:[%s1738_s0 + $0xf0] ss:$8 sps:$4 sm:$0xff]  }
  0x11   :  { %v825_v51 = vld [vmem:[%s1739_s2] sm:$0xff]  ;;  %v826_v61 = vld [vmem:[%s1739_s2 + $0x8] sm:$0xff] }
  0x12   :  { %v841_v53 = vld [vmem:[%s1739_s2 + $0x80] sm:$0xff]  ;;  %v842_v63 = vld [vmem:[%s1739_s2 + $0x88] sm:$0xff] }
  0x13   :  { %1145 = vmatpush3.bf16.msra.mxu0 %v1273_v9  ;;  %1260 = vmatpush3.bf16.msra.mxu1 %v1273_v9 }
  0x14   :  { %1146 = vmatprep.subr.bf16.mxu0 %v1274_v10  ;;  %1253 = vmatprep.subr.bf16.mxu1 %v1274_v10 }
  0x17   :  { %1147 = vmatpush3.bf16.msra.mxu0 %v1275_v13  ;;  %1261 = vmatpush3.bf16.msra.mxu1 %v1275_v13 }
  0x18   :  { %1148 = vmatprep.subr.bf16.mxu0 %v1276_v14  ;;  %1254 = vmatprep.subr.bf16.mxu1 %v1276_v14 }
  0x1b   :  { %1149 = vmatpush3.bf16.msra.mxu0 %v1277_v15  ;;  %1262 = vmatpush3.bf16.msra.mxu1 %v1277_v15 }
  0x1c   :  { %1150 = vmatprep.subr.bf16.mxu0 %v1278_v16  ;;  %1255 = vmatprep.subr.bf16.mxu1 %v1278_v16 }
  0x1f   :  { %1151 = vmatpush3.bf16.msra.mxu0 %v1279_v17  ;;  %1263 = vmatpush3.bf16.msra.mxu1 %v1279_v17 }
  0x22   :  { %438 = vmatmul.mubr.bf16.vlgmr.msra.gmra.mxu0 %v1280_v18  ;;  %502 = vmatmul.mubr.bf16.vlgmr.msra.gmra.mxu1 %v1283_v19 }
  0x23   :  { %445 = vmatprep.mubr.bf16.mxu0 %v1286_v20  ;;  %509 = vmatprep.mubr.bf16.mxu1 %v1288_v21 }
  0x2a   :  { %446 = vmatmul.mubr.bf16.gmra.mxu0 %v1290_v22  ;;  %510 = vmatmul.mubr.bf16.gmra.mxu1 %v1291_v23 }
  0x2b   :  { %453 = vmatprep.mubr.bf16.mxu0 %v1292_v24  ;;  %517 = vmatprep.mubr.bf16.mxu1 %v1294_v25 }
  0x32   :  { %454 = vmatmul.mubr.bf16.gmra.mxu0 %v1296_v26  ;;  %518 = vmatmul.mubr.bf16.gmra.mxu1 %v1297_v27 }
  0x33   :  { %461 = vmatprep.mubr.bf16.mxu0 %v1298_v28  ;;  %525 = vmatprep.mubr.bf16.mxu1 %v1300_v29 }
  0x3a   :  { %462 = vmatmul.mubr.bf16.gmra.mxu0 %v1302_v30  ;;  %526 = vmatmul.mubr.bf16.gmra.mxu1 %v1303_v31 }
  0x3b   :  { %469 = vmatprep.mubr.bf16.mxu0 %v1304_v32  ;;  %533 = vmatprep.mubr.bf16.mxu1 %v1306_v33 }
  0x42   :  { %470 = vmatmul.mubr.bf16.gmra.mxu0 %v1308_v34  ;;  %534 = vmatmul.mubr.bf16.gmra.mxu1 %v1309_v35 }
  0x43   :  { %477 = vmatprep.mubr.bf16.mxu0 %v1310_v36  ;;  %541 = vmatprep.mubr.bf16.mxu1 %v1312_v37 }
  0x4a   :  { %478 = vmatmul.mubr.bf16.gmra.mxu0 %v1314_v38  ;;  %542 = vmatmul.mubr.bf16.gmra.mxu1 %v1315_v39 }
  0x4b   :  { %485 = vmatprep.mubr.bf16.mxu0 %v1316_v40  ;;  %549 = vmatprep.mubr.bf16.mxu1 %v1318_v41 }
  0x52   :  { %486 = vmatmul.mubr.bf16.gmra.mxu0 %v1320_v42  ;;  %550 = vmatmul.mubr.bf16.gmra.mxu1 %v1321_v43 }
  0x53   :  { %493 = vmatprep.mubr.bf16.mxu0 %v1322_v44  ;;  %557 = vmatprep.mubr.bf16.mxu1 %v1324_v45 }
  0x5a   :  { %494 = vmatmul.mubr.bf16.gmra.mxu0 %v1326_v46  ;;  %558 = vmatmul.mubr.bf16.gmra.mxu1 %v1327_v47 }
  0xe2   :  { %v1152_v48 = vpop.f32.mrf.mxu0  ;;  %v1200_v49 = vpop.f32.mrf.mxu1 }
  0xe4   :  { %v1153_v50 = vpop.f32.mrf.mxu0  ;;  %v1201_v52 = vpop.f32.mrf.mxu1 }
  0xe5   :  { %v1154_v54 = vadd.f32 %v1153_v50, %v1152_v48  ;;  %v1202_v55 = vadd.f32 %v1201_v52, %v1200_v49 }
  0xe6   :  { %v1155_v56 = vpop.f32.mrf.mxu0  ;;  %v1203_v57 = vpop.f32.mrf.mxu1 }
  0xe7   :  { %v857_v58 = vadd.f32 %v1154_v54, %v825_v51  ;;  %v873_v59 = vadd.f32 %v1202_v55, %v841_v53 }
  0xe8   :  { %v1156_v60 = vpop.f32.mrf.mxu0  ;;  %v1204_v62 = vpop.f32.mrf.mxu1 }
  0xe9   :  { %889 = vst [vmem:[%s1740_s4] sm:$0xff] %v857_v58  ;;  %905 = vst [vmem:[%s1740_s4 + $0x80] sm:$0xff] %v873_v59  ;;  %v1157_v0 = vadd.f32 %v1156_v60, %v1155_v56  ;;  %v1205_v1 = vadd.f32 %v1204_v62, %v1203_v57 }
  0xea   :  { %v1158_v2 = vpop.f32.mrf.mxu0  ;;  %v1206_v3 = vpop.f32.mrf.mxu1 }
  0xeb   :  { %v1044_v4 = vpack.c.bf16 %v1157_v0, %v1154_v54  ;;  %v858_v5 = vadd.f32 %v1157_v0, %v826_v61  ;;  %v1084_v6 = vpack.c.bf16 %v1205_v1, %v1202_v55  ;;  %v874_v7 = vadd.f32 %v1205_v1, %v842_v63 }
  0xec   :  { %v1159_v8 = vpop.f32.mrf.mxu0  ;;  %v1207_v10 = vpop.f32.mrf.mxu1 }
  0xed   :  { %1045 = vst [vmem:[%s1741_s3] sm:$0xff] %v1044_v4   ;;  %1128 = vst [vmem:[%s1741_s3 + $0x40] sm:$0xff] %v1084_v6   ;;  %v1160_v12 = vadd.f32 %v1159_v8, %v1158_v2  ;;  %v1208_v13 = vadd.f32 %v1207_v10, %v1206_v3 }
  0xee   :  { %v1161_v14 = vpop.f32.mrf.mxu0  ;;  %v1209_v15 = vpop.f32.mrf.mxu1 }
  0xf0   :  { %v827_v9 = vld [vmem:[%s1739_s2 + $0x10] sm:$0xff]  ;;  %v1162_v18 = vpop.f32.mrf.mxu0  ;;  %v1210_v20 = vpop.f32.mrf.mxu1 }
  0xf1   :  { %v843_v11 = vld [vmem:[%s1739_s2 + $0x90] sm:$0xff]  ;;  %v859_v16 = vadd.f32 %v1160_v12, %v827_v9  ;;  %v1163_v22 = vadd.f32 %v1162_v18, %v1161_v14  ;;  %v1211_v23 = vadd.f32 %v1210_v20, %v1209_v15 }
  0xf2   :  { %890 = vst [vmem:[%s1740_s4 + $0x8] sm:$0xff] %v858_v5  ;;  %906 = vst [vmem:[%s1740_s4 + $0x88] sm:$0xff] %v874_v7  ;;  %v875_v17 = vadd.f32 %v1208_v13, %v843_v11  ;;  %v1164_v24 = vpop.f32.mrf.mxu0  ;;  %v1212_v25 = vpop.f32.mrf.mxu1 }
  0xf3   :  { %v1049_v26 = vpack.c.bf16 %v1163_v22, %v1160_v12  ;;  %v1089_v28 = vpack.c.bf16 %v1211_v23, %v1208_v13 }
  0xf4   :  { %v1165_v30 = vpop.f32.mrf.mxu0  ;;  %v1213_v32 = vpop.f32.mrf.mxu1 }
  0xf5   :  { %1121 = vst [vmem:[%s1741_s3 + $0x8] sm:$0xff] %v1049_v26   ;;  %1129 = vst [vmem:[%s1741_s3 + $0x48] sm:$0xff] %v1089_v28   ;;  %v1166_v34 = vadd.f32 %v1165_v30, %v1164_v24  ;;  %v1214_v35 = vadd.f32 %v1213_v32, %v1212_v25 }
  0xf6   :  { %v1167_v36 = vpop.f32.mrf.mxu0  ;;  %v1215_v37 = vpop.f32.mrf.mxu1 }
  0xf8   :  { %v1168_v40 = vpop.f32.mrf.mxu0  ;;  %v1216_v42 = vpop.f32.mrf.mxu1 }
  0xf9   :  { %v828_v19 = vld [vmem:[%s1739_s2 + $0x18] sm:$0xff]  ;;  %v1169_v44 = vadd.f32 %v1168_v40, %v1167_v36  ;;  %v1217_v45 = vadd.f32 %v1216_v42, %v1215_v37 }
  0xfa   :  { %v844_v21 = vld [vmem:[%s1739_s2 + $0x98] sm:$0xff]  ;;  %v860_v27 = vadd.f32 %v1163_v22, %v828_v19  ;;  %v1170_v46 = vpop.f32.mrf.mxu0  ;;  %v1218_v47 = vpop.f32.mrf.mxu1 }
  0xfb   :  { %891 = vst [vmem:[%s1740_s4 + $0x10] sm:$0xff] %v859_v16  ;;  %907 = vst [vmem:[%s1740_s4 + $0x90] sm:$0xff] %v875_v17  ;;  %v876_v29 = vadd.f32 %v1211_v23, %v844_v21  ;;  %v1054_v48 = vpack.c.bf16 %v1169_v44, %v1166_v34  ;;  %v1094_v50 = vpack.c.bf16 %v1217_v45, %v1214_v35 }
  0xfc   :  { %v1171_v52 = vpop.f32.mrf.mxu0  ;;  %v1219_v54 = vpop.f32.mrf.mxu1 }
  0xfd   :  { %1122 = vst [vmem:[%s1741_s3 + $0x10] sm:$0xff] %v1054_v48   ;;  %1130 = vst [vmem:[%s1741_s3 + $0x50] sm:$0xff] %v1094_v50   ;;  %v1172_v56 = vadd.f32 %v1171_v52, %v1170_v46  ;;  %v1220_v57 = vadd.f32 %v1219_v54, %v1218_v47 }
  0xfe   :  { %v1173_v58 = vpop.f32.mrf.mxu0  ;;  %v1221_v59 = vpop.f32.mrf.mxu1 }
 0x100   :  { %v1174_v62 = vpop.f32.mrf.mxu0  ;;  %v1222_v0 = vpop.f32.mrf.mxu1 }
 0x101   :  { %v1175_v2 = vadd.f32 %v1174_v62, %v1173_v58  ;;  %v1223_v3 = vadd.f32 %v1222_v0, %v1221_v59 }
 0x102   :  { %v829_v31 = vld [vmem:[%s1739_s2 + $0x20] sm:$0xff]  ;;  %v1176_v4 = vpop.f32.mrf.mxu0  ;;  %v1224_v5 = vpop.f32.mrf.mxu1 }
 0x103   :  { %v845_v33 = vld [vmem:[%s1739_s2 + $0xa0] sm:$0xff]  ;;  %v861_v38 = vadd.f32 %v1166_v34, %v829_v31  ;;  %v1059_v6 = vpack.c.bf16 %v1175_v2, %v1172_v56  ;;  %v1099_v8 = vpack.c.bf16 %v1223_v3, %v1220_v57 }
 0x104   :  { %892 = vst [vmem:[%s1740_s4 + $0x18] sm:$0xff] %v860_v27  ;;  %908 = vst [vmem:[%s1740_s4 + $0x98] sm:$0xff] %v876_v29  ;;  %v877_v39 = vadd.f32 %v1214_v35, %v845_v33  ;;  %v1177_v10 = vpop.f32.mrf.mxu0  ;;  %v1225_v12 = vpop.f32.mrf.mxu1 }
 0x105   :  { %1123 = vst [vmem:[%s1741_s3 + $0x18] sm:$0xff] %v1059_v6   ;;  %1131 = vst [vmem:[%s1741_s3 + $0x58] sm:$0xff] %v1099_v8   ;;  %v1178_v14 = vadd.f32 %v1177_v10, %v1176_v4  ;;  %v1226_v15 = vadd.f32 %v1225_v12, %v1224_v5 }
 0x106   :  { %v1179_v16 = vpop.f32.mrf.mxu0  ;;  %v1227_v17 = vpop.f32.mrf.mxu1 }
 0x108   :  { %v1180_v20 = vpop.f32.mrf.mxu0  ;;  %v1228_v22 = vpop.f32.mrf.mxu1 }
 0x109   :  { %v1181_v24 = vadd.f32 %v1180_v20, %v1179_v16  ;;  %v1229_v25 = vadd.f32 %v1228_v22, %v1227_v17 }
 0x10a   :  { %v1182_v26 = vpop.f32.mrf.mxu0  ;;  %v1230_v27 = vpop.f32.mrf.mxu1 }
 0x10b   :  { %v830_v41 = vld [vmem:[%s1739_s2 + $0x28] sm:$0xff]  ;;  %v1064_v28 = vpack.c.bf16 %v1181_v24, %v1178_v14  ;;  %v1104_v30 = vpack.c.bf16 %v1229_v25, %v1226_v15 }
 0x10c   :  { %v846_v43 = vld [vmem:[%s1739_s2 + $0xa8] sm:$0xff]  ;;  %v862_v49 = vadd.f32 %v1169_v44, %v830_v41  ;;  %v1183_v32 = vpop.f32.mrf.mxu0  ;;  %v1231_v34 = vpop.f32.mrf.mxu1 }
 0x10d   :  { %893 = vst [vmem:[%s1740_s4 + $0x20] sm:$0xff] %v861_v38  ;;  %909 = vst [vmem:[%s1740_s4 + $0xa0] sm:$0xff] %v877_v39  ;;  %v878_v51 = vadd.f32 %v1217_v45, %v846_v43  ;;  %v1184_v36 = vadd.f32 %v1183_v32, %v1182_v26  ;;  %v1232_v37 = vadd.f32 %v1231_v34, %v1230_v27 }
 0x10e   :  { %1124 = vst [vmem:[%s1741_s3 + $0x20] sm:$0xff] %v1064_v28   ;;  %1132 = vst [vmem:[%s1741_s3 + $0x60] sm:$0xff] %v1104_v30   ;;  %v1185_v38 = vpop.f32.mrf.mxu0  ;;  %v1233_v39 = vpop.f32.mrf.mxu1 }
 0x110   :  { %v1186_v42 = vpop.f32.mrf.mxu0  ;;  %v1234_v44 = vpop.f32.mrf.mxu1 }
 0x111   :  { %v1187_v46 = vadd.f32 %v1186_v42, %v1185_v38  ;;  %v1235_v47 = vadd.f32 %v1234_v44, %v1233_v39 }
 0x112   :  { %v1188_v48 = vpop.f32.mrf.mxu0 }
 0x113   :  { %v1069_v50 = vpack.c.bf16 %v1187_v46, %v1184_v36  ;;  %v1109_v52 = vpack.c.bf16 %v1235_v47, %v1232_v37 }
 0x114   :  { %v831_v53 = vld [vmem:[%s1739_s2 + $0x30] sm:$0xff]  ;;  %v1189_v54 = vpop.f32.mrf.mxu0 }
 0x115   :  { %v847_v55 = vld [vmem:[%s1739_s2 + $0xb0] sm:$0xff]  ;;  %v863_v60 = vadd.f32 %v1172_v56, %v831_v53  ;;  %1125 = vst [vmem:[%s1741_s3 + $0x28] sm:$0xff] %v1069_v50   ;;  %1133 = vst [vmem:[%s1741_s3 + $0x68] sm:$0xff] %v1109_v52   ;;  %v1190_v58 = vadd.f32 %v1189_v54, %v1188_v48 }
 0x116   :  { %894 = vst [vmem:[%s1740_s4 + $0x28] sm:$0xff] %v862_v49  ;;  %910 = vst [vmem:[%s1740_s4 + $0xa8] sm:$0xff] %v878_v51  ;;  %v879_v61 = vadd.f32 %v1220_v57, %v847_v55  ;;  %v1236_v49 = vpop.f32.mrf.mxu1 }
 0x118   :  { %v1237_v56 = vpop.f32.mrf.mxu1 }
 0x119   :  { %v1238_v59 = vadd.f32 %v1237_v56, %v1236_v49 }
 0x11d   :  { %v832_v63 = vld [vmem:[%s1739_s2 + $0x38] sm:$0xff] }
 0x11e   :  { %v848_v1 = vld [vmem:[%s1739_s2 + $0xb8] sm:$0xff]  ;;  %v864_v7 = vadd.f32 %v1175_v2, %v832_v63 }
 0x11f   :  { %895 = vst [vmem:[%s1740_s4 + $0x30] sm:$0xff] %v863_v60  ;;  %911 = vst [vmem:[%s1740_s4 + $0xb0] sm:$0xff] %v879_v61  ;;  %v880_v9 = vadd.f32 %v1223_v3, %v848_v1  ;;  %v1191_v60 = vpop.f32.mrf.mxu0  ;;  %v1239_v61 = vpop.f32.mrf.mxu1 }
 0x121   :  { %v1192_v0 = vpop.f32.mrf.mxu0  ;;  %v1240_v2 = vpop.f32.mrf.mxu1 }
 0x122   :  { %v1193_v4 = vadd.f32 %v1192_v0, %v1191_v60  ;;  %v1241_v5 = vadd.f32 %v1240_v2, %v1239_v61 }
 0x123   :  { %v1194_v6 = vpop.f32.mrf.mxu0 }
 0x124   :  { %v1074_v8 = vpack.c.bf16 %v1193_v4, %v1190_v58  ;;  %v1114_v10 = vpack.c.bf16 %v1241_v5, %v1238_v59 }
 0x125   :  { %v1195_v12 = vpop.f32.mrf.mxu0 }
 0x126   :  { %v833_v11 = vld [vmem:[%s1739_s2 + $0x40] sm:$0xff]  ;;  %1126 = vst [vmem:[%s1741_s3 + $0x30] sm:$0xff] %v1074_v8   ;;  %1134 = vst [vmem:[%s1741_s3 + $0x70] sm:$0xff] %v1114_v10   ;;  %v1196_v16 = vadd.f32 %v1195_v12, %v1194_v6 }
 0x127   :  { %v849_v13 = vld [vmem:[%s1739_s2 + $0xc0] sm:$0xff]  ;;  %v865_v18 = vadd.f32 %v1178_v14, %v833_v11 }
 0x128   :  { %896 = vst [vmem:[%s1740_s4 + $0x38] sm:$0xff] %v864_v7  ;;  %912 = vst [vmem:[%s1740_s4 + $0xb8] sm:$0xff] %v880_v9  ;;  %v881_v19 = vadd.f32 %v1226_v15, %v849_v13  ;;  %v1242_v7 = vpop.f32.mrf.mxu1 }
 0x12a   :  { %v1243_v14 = vpop.f32.mrf.mxu1 }
 0x12b   :  { %v1244_v17 = vadd.f32 %v1243_v14, %v1242_v7 }
 0x12f   :  { %v834_v21 = vld [vmem:[%s1739_s2 + $0x48] sm:$0xff] }
 0x130   :  { %v850_v23 = vld [vmem:[%s1739_s2 + $0xc8] sm:$0xff]  ;;  %v866_v29 = vadd.f32 %v1181_v24, %v834_v21 }
 0x131   :  { %897 = vst [vmem:[%s1740_s4 + $0x40] sm:$0xff] %v865_v18  ;;  %913 = vst [vmem:[%s1740_s4 + $0xc0] sm:$0xff] %v881_v19  ;;  %v882_v31 = vadd.f32 %v1229_v25, %v850_v23  ;;  %v1197_v18 = vpop.f32.mrf.mxu0  ;;  %v1245_v19 = vpop.f32.mrf.mxu1 }
 0x133   :  { %v1198_v22 = vpop.f32.mrf.mxu0  ;;  %v1246_v24 = vpop.f32.mrf.mxu1 }
 0x134   :  { %v1199_v26 = vadd.f32 %v1198_v22, %v1197_v18  ;;  %v1247_v27 = vadd.f32 %v1246_v24, %v1245_v19 }
 0x136   :  { %v1079_v28 = vpack.c.bf16 %v1199_v26, %v1196_v16  ;;  %v1119_v30 = vpack.c.bf16 %v1247_v27, %v1244_v17 }
 0x138   :  { %v835_v33 = vld [vmem:[%s1739_s2 + $0x50] sm:$0xff]  ;;  %1127 = vst [vmem:[%s1741_s3 + $0x38] sm:$0xff] %v1079_v28   ;;  %1135 = vst [vmem:[%s1741_s3 + $0x78] sm:$0xff] %v1119_v30  }
 0x139   :  { %v851_v35 = vld [vmem:[%s1739_s2 + $0xd0] sm:$0xff]  ;;  %v867_v40 = vadd.f32 %v1184_v36, %v835_v33 }
 0x13a   :  { %898 = vst [vmem:[%s1740_s4 + $0x48] sm:$0xff] %v866_v29  ;;  %914 = vst [vmem:[%s1740_s4 + $0xc8] sm:$0xff] %v882_v31  ;;  %v883_v41 = vadd.f32 %v1232_v37, %v851_v35 }
 0x141   :  { %v836_v43 = vld [vmem:[%s1739_s2 + $0x58] sm:$0xff] }
 0x142   :  { %v852_v45 = vld [vmem:[%s1739_s2 + $0xd8] sm:$0xff]  ;;  %v868_v51 = vadd.f32 %v1187_v46, %v836_v43 }
 0x143   :  { %899 = vst [vmem:[%s1740_s4 + $0x50] sm:$0xff] %v867_v40  ;;  %915 = vst [vmem:[%s1740_s4 + $0xd0] sm:$0xff] %v883_v41  ;;  %v884_v53 = vadd.f32 %v1235_v47, %v852_v45 }
 0x14a   :  { %v837_v55 = vld [vmem:[%s1739_s2 + $0x60] sm:$0xff] }
 0x14b   :  { %v853_v57 = vld [vmem:[%s1739_s2 + $0xe0] sm:$0xff]  ;;  %v869_v62 = vadd.f32 %v1190_v58, %v837_v55 }
 0x14c   :  { %900 = vst [vmem:[%s1740_s4 + $0x58] sm:$0xff] %v868_v51  ;;  %916 = vst [vmem:[%s1740_s4 + $0xd8] sm:$0xff] %v884_v53  ;;  %v885_v63 = vadd.f32 %v1238_v59, %v853_v57 }
 0x153   :  { %v838_v1 = vld [vmem:[%s1739_s2 + $0x68] sm:$0xff] }
 0x154   :  { %v854_v3 = vld [vmem:[%s1739_s2 + $0xe8] sm:$0xff]  ;;  %v870_v9 = vadd.f32 %v1193_v4, %v838_v1 }
 0x155   :  { %901 = vst [vmem:[%s1740_s4 + $0x60] sm:$0xff] %v869_v62  ;;  %917 = vst [vmem:[%s1740_s4 + $0xe0] sm:$0xff] %v885_v63  ;;  %v886_v11 = vadd.f32 %v1241_v5, %v854_v3 }
 0x15c   :  { %v839_v13 = vld [vmem:[%s1739_s2 + $0x70] sm:$0xff] }
 0x15d   :  { %v855_v15 = vld [vmem:[%s1739_s2 + $0xf0] sm:$0xff]  ;;  %v871_v20 = vadd.f32 %v1196_v16, %v839_v13 }
 0x15e   :  { %902 = vst [vmem:[%s1740_s4 + $0x68] sm:$0xff] %v870_v9  ;;  %918 = vst [vmem:[%s1740_s4 + $0xe8] sm:$0xff] %v886_v11  ;;  %v887_v21 = vadd.f32 %v1244_v17, %v855_v15 }
 0x165   :  { %v840_v23 = vld [vmem:[%s1739_s2 + $0x78] sm:$0xff] }
 0x166   :  { %v856_v25 = vld [vmem:[%s1739_s2 + $0xf8] sm:$0xff]  ;;  %v872_v29 = vadd.f32 %v1199_v26, %v840_v23 }
 0x167   :  { %903 = vst [vmem:[%s1740_s4 + $0x70] sm:$0xff] %v871_v20  ;;  %919 = vst [vmem:[%s1740_s4 + $0xf0] sm:$0xff] %v887_v21  ;;  %v888_v31 = vadd.f32 %v1247_v27, %v856_v25 }
 0x168   :  { %904 = vst [vmem:[%s1740_s4 + $0x78] sm:$0xff] %v872_v29 }
 0x169   :  { %920 = vst [vmem:[%s1740_s4 + $0xf8] sm:$0xff] %v888_v31 }

</bundles_post_ra>
